<compile_context>
chip_gen: v7x
topology: tpu7x:2x2x1
jax: 0.10.0
libtpu: 0.0.40
codegen_flags: <defaults>
</compile_context>

<pallas_src>
import jax
import jax.numpy as jnp
from jax import lax
from jax.experimental import pallas as pl
from jax.experimental.pallas import tpu as pltpu


def bert_pooler_kernel(x_ref, w_ref, b_ref, o_ref):
    # x_ref : [tb, H_in]   first-token activations for this batch tile
    # w_ref : [tn, H_in]   PyTorch nn.Linear layout (out, in)
    # b_ref : [1,  tn]
    # o_ref : [tb, tn]
    # x @ W.T without materializing a transpose: contract the last dim of both
    # operands (MXU-native transposed-RHS, same pattern as q @ k.T).
    y = lax.dot_general(
        x_ref[...], w_ref[...],
        dimension_numbers=(((1,), (1,)), ((), ())),
        preferred_element_type=jnp.float32,
    )
    y = y + b_ref[...].astype(jnp.float32)
    o_ref[...] = jnp.tanh(y).astype(o_ref.dtype)


def bert_pooler(hidden_states, weight, bias, *, block_b=512, block_n=512,
                resident_weight_bytes=12 * 1024 * 1024):
    """hidden_states: [B, S, H]; weight: [H, H] (out, in); bias: [H]."""
    B, S, H = hidden_states.shape
    out_dtype = hidden_states.dtype
    w_itemsize = jnp.dtype(weight.dtype).itemsize
    x_itemsize = jnp.dtype(hidden_states.dtype).itemsize

    # ---- first-token selection folded into the BlockSpec --------------------
    if H % 128 == 0 or S == 1:
        # Free layout-preserving view [B, S, H] -> [B, S*H]; the x BlockSpec
        # below grabs only the leading H lanes of each row (token 0).
        x = hidden_states.reshape(B, S * H)
    else:
        # Lane-unaligned H: fall back to a small strided [B, H] slice.
        # TODO(synk): fold this case into the BlockSpec once unaligned lane
        # blocks are worth supporting here.
        x = hidden_states[:, 0]
    b2 = bias.reshape(1, H)

    # ---- tiling --------------------------------------------------------------
    # Batch tile: single block for the common small-batch pooler case (see
    # header note 9); multiple 512-row blocks otherwise (ragged tail masked).
    tb = B if B <= block_b else block_b
    grid_b = pl.cdiv(B, tb)

    # H_out tile: keep the whole [H, H] weight resident (single-buffered) when
    # it fits; otherwise stream [tn, H] slices double-buffered over the
    # innermost grid axis so the x tile stays resident across it.
    resident = H * H * w_itemsize <= resident_weight_bytes
    tn = H if resident else min(block_n, H)
    grid_n = pl.cdiv(H, tn)

    res_kwargs = dict(pipeline_mode=pl.Buffered(1)) if resident else {}
    in_specs = [
        pl.BlockSpec((tb, H), lambda i, j: (i, 0)),                 # x (token 0 cols)
        pl.BlockSpec((tn, H), lambda i, j: (j, 0), **res_kwargs),   # weight
        pl.BlockSpec((1, tn), lambda i, j: (0, j), **res_kwargs),   # bias
    ]
    out_spec = pl.BlockSpec((tb, tn), lambda i, j: (i, j))

    # ---- VMEM + cost bookkeeping ---------------------------------------------
    w_bufs = (1 if resident else 2) * tn * H * w_itemsize
    x_bufs = 2 * tb * H * x_itemsize
    o_bufs = 2 * tb * tn * jnp.dtype(out_dtype).itemsize
    b_bufs = 2 * tn * jnp.dtype(bias.dtype).itemsize
    vmem_limit = int(w_bufs + x_bufs + o_bufs + b_bufs) + (8 << 20)
    vmem_limit = max(16 << 20, min(vmem_limit, 60 << 20))

    cost = pl.CostEstimate(
        flops=2 * B * H * H,
        transcendentals=B * H,
        bytes_accessed=(B * H * x_itemsize                       # first-token slab
                        + H * H * w_itemsize                     # weight
                        + H * jnp.dtype(bias.dtype).itemsize     # bias
                        + B * H * jnp.dtype(out_dtype).itemsize  # output
                        ),
    )

    return pl.pallas_call(
        bert_pooler_kernel,
        out_shape=jax.ShapeDtypeStruct((B, H), out_dtype),
        grid_spec=pltpu.PrefetchScalarGridSpec(
            num_scalar_prefetch=0,
            grid=(grid_b, grid_n),
            in_specs=in_specs,
            out_specs=out_spec,
        ),
        compiler_params=pltpu.CompilerParams(
            dimension_semantics=("parallel", "parallel"),
            vmem_limit_bytes=vmem_limit,
        ),
        cost_estimate=cost,
    )(x, weight, b2)


if __name__ == "__main__":
    key = jax.random.PRNGKey(0)

    def run_case(B, S, H):
        k_h, k_w, k_b = jax.random.split(jax.random.fold_in(key, H), 3)
        hidden_states = jax.random.normal(k_h, (B, S, H), dtype=jnp.float32)
        # nn.Linear(H, H): weight [H_out, H_in], bias [H_out].
        weight = jax.random.normal(k_w, (H, H), dtype=jnp.float32) / jnp.sqrt(H)
        bias = jax.random.normal(k_b, (H,), dtype=jnp.float32) * 0.01

        out = jax.block_until_ready(bert_pooler(hidden_states, weight, bias))

        ref = jnp.tanh(hidden_states[:, 0] @ weight.T + bias)
        assert out.shape == (B, H)
        assert jnp.allclose(out, ref, atol=1e-4, rtol=1e-4), float(
            jnp.max(jnp.abs(out - ref)))
        return out

    run_case(B=2, S=8, H=128)   # lane-aligned: first-token fold via BlockSpec
    run_case(B=2, S=8, H=32)    # lane-unaligned fallback path

    print("KERNEL_OK")
</pallas_src>

<mosaic_0001>
module attributes {stable_mosaic.version = 11 : i64} {
  func.func @bert_pooler_kernel(%arg0: i32, %arg1: i32, %arg2: memref<2x128xf32, #tpu.memory_space<vmem>>, %arg3: memref<128x128xf32, #tpu.memory_space<vmem>>, %arg4: memref<1x128xf32, #tpu.memory_space<vmem>>, %arg5: memref<2x128xf32, #tpu.memory_space<vmem>>) attributes {dimension_semantics = [#tpu.dimension_semantics<parallel>, #tpu.dimension_semantics<parallel>], iteration_bounds = array<i64: 1, 1>, scalar_prefetch = 0 : i64, scratch_operands = 0 : i64, tpu.core_type = #tpu.core_type<tc>, window_params = [{transform_indices = @transform_0, window_bounds = array<i64: 2, 128>}, {pipeline_mode = #tpu.pipeline_mode<synchronous>, transform_indices = @transform_1, window_bounds = array<i64: 128, 128>}, {pipeline_mode = #tpu.pipeline_mode<synchronous>, transform_indices = @transform_2, window_bounds = array<i64: 1, 128>}, {transform_indices = @transform_3, window_bounds = array<i64: 2, 128>}]} {
    %c0 = arith.constant 0 : index
    %c0_0 = arith.constant 0 : index
    %0 = vector.load %arg2[%c0, %c0_0] : memref<2x128xf32, #tpu.memory_space<vmem>>, vector<2x128xf32>
    %c0_1 = arith.constant 0 : index
    %c0_2 = arith.constant 0 : index
    %1 = vector.load %arg3[%c0_1, %c0_2] : memref<128x128xf32, #tpu.memory_space<vmem>>, vector<128x128xf32>
    %cst = arith.constant dense<0.000000e+00> : vector<2x128xf32>
    %2 = tpu.matmul %0, %1, %cst {dimension_numbers = #tpu.dot_dimension_numbers<[1], [1], [0], [0], [0, 0, 1, 0], [], []>} : vector<2x128xf32>, vector<128x128xf32>, vector<2x128xf32> -> vector<2x128xf32>
    %c0_3 = arith.constant 0 : index
    %c0_4 = arith.constant 0 : index
    %3 = vector.load %arg4[%c0_3, %c0_4] : memref<1x128xf32, #tpu.memory_space<vmem>>, vector<1x128xf32>
    %4 = vector.broadcast %3 : vector<1x128xf32> to vector<2x128xf32>
    %5 = arith.addf %2, %4 : vector<2x128xf32>
    %6 = math.tanh %5 : vector<2x128xf32>
    %c0_5 = arith.constant 0 : index
    %c0_6 = arith.constant 0 : index
    %7 = vector.load %arg5[%c0_5, %c0_6] : memref<2x128xf32, #tpu.memory_space<vmem>>, vector<2x128xf32>
    tpu.vector_store %arg5[%c0_5, %c0_6], %6 {strides = array<i32>} : memref<2x128xf32, #tpu.memory_space<vmem>>, vector<2x128xf32>,
    return
  }
  func.func @transform_0(%arg0: i32, %arg1: i32) -> (i32, i32) {
    %c0_i32 = arith.constant 0 : i32
    %c0_i32_0 = arith.constant 0 : i32
    return %arg0, %c0_i32 : i32, i32
  }
  func.func @transform_1(%arg0: i32, %arg1: i32) -> (i32, i32) {
    %c0_i32 = arith.constant 0 : i32
    %c0_i32_0 = arith.constant 0 : i32
    return %arg1, %c0_i32 : i32, i32
  }
  func.func @transform_2(%arg0: i32, %arg1: i32) -> (i32, i32) {
    %c0_i32 = arith.constant 0 : i32
    %c0_i32_0 = arith.constant 0 : i32
    return %c0_i32, %arg1 : i32, i32
  }
  func.func @transform_3(%arg0: i32, %arg1: i32) -> (i32, i32) {
    %c0_i32 = arith.constant 0 : i32
    return %arg0, %arg1 : i32, i32
  }
}

</mosaic_0001>

<bundles_post_ra>
// kernel: tpu_custom_call.1
= control target key start
LH: loop header
LB: loop body
LE: loop exit
PB: predicated region body
PF: predicated region fallthrough
CT: control target
= control target key end

     0   :  { %8 = vsyncpa [#allocation3], 0  ;;  %s389_s0 = inlined_call_operand.hbm [shape: f32[2,1024], index: 0, kind: input, shape index: {}]   ;;  %s390_s1 = inlined_call_operand.hbm [shape: f32[128,128], index: 1, kind: input, shape index: {}]   ;;  %s391_s2 = inlined_call_operand.vmem [shape: f32[1,128], index: 2, kind: input, shape index: {}]   ;;  %s392_s3 = inlined_call_operand.hbm [shape: f32[2,128], index: 3, kind: output, shape index: {}]  }
   0x1   :  { %9 = vsyncpa [#allocation6], 0 }
   0x2   :  { %10 = vsyncpa [#allocation4], 0  ;;  %s312_s12 = smov [#allocation2]   ;;  %s313_s14 = smov [#allocation5]  }
   0x3   :  { %s17_s13 = sshll.u32 %s312_s12, 4  ;;  %s26_s15 = sshll.u32 %s313_s14, 4  ;;  %s18_s13 = int_to_ptr.vmem [resolvable:$true] %s17_s13  ;;  %s340_s15 = int_to_ptr.vmem [resolvable:$true] %s26_s15 }
   0x4   :  { %s240_s18 = scalar_lea.hbm %s389_s0, 32  ;;  %s242_s23 = scalar_lea.hbm %s389_s0, 256 }
   0x5   :  { %p241_p0 = scmp.ne.s32.totalorder %s389_s0, %s240_s18  ;;  %p243_p1 = scmp.lt.u32.totalorder %s242_s23, %s240_s18 }
   0x6   :  { %p244_p2 = scmp.lt.u32.totalorder %s240_s18, %s389_s0 }
   0x8   :  { %p245_p3 = por %p244_p2, %p243_p1 }
   0xa   :  { %p246_p4 = pnand %p245_p3, %p241_p0 }
   0xc   :  { %249 = shalt.err (!%p246_p4)
}
   0xd   :  { %s250_s26 = scalar_lea.vmem %s18_s13, 32  ;;  %p255_p6 = scmp.lt.s32.totalorder %s18_s13, %s18_s13 }
   0xe   :  { %p251_p5 = scmp.ne.s32.totalorder %s18_s13, %s250_s26  ;;  %p256_p7 = scmp.lt.s32.totalorder %s250_s26, %s250_s26 }
  0x10   :  { %p257_p8 = por %p256_p7, %p255_p6 }
  0x12   :  { %p258_p9 = pnand %p257_p8, %p251_p5 }
  0x14   :  { %261 = shalt.err (!%p258_p9)
}
  0x15   :  { %20 = dma.hbm_to_vmem [thread:$0]  %s389_s0, 32, %s18_s13, [#allocation3]  }
  0x16   :  { %s262_s4 = scalar_lea.hbm %s390_s1, 2048 }
  0x17   :  { %p263_p10 = scmp.ne.s32.totalorder %s390_s1, %s262_s4  ;;  %p266_p11 = scmp.lt.u32.totalorder %s262_s4, %s390_s1 }
  0x19   :  { %p268_p12 = pnand %p266_p11, %p263_p10 }
  0x1b   :  { %271 = shalt.err (!%p268_p12)
}
  0x1c   :  { %s272_s9 = scalar_lea.vmem %s340_s15, 2048  ;;  %p277_p0 = scmp.lt.s32.totalorder %s340_s15, %s340_s15 }
  0x1d   :  { %p273_p13 = scmp.ne.s32.totalorder %s340_s15, %s272_s9  ;;  %p278_p1 = scmp.lt.s32.totalorder %s272_s9, %s272_s9 }
  0x1f   :  { %p279_p2 = por %p278_p1, %p277_p0 }
  0x21   :  { %p280_p3 = pnand %p279_p2, %p273_p13 }
  0x23   :  { %283 = shalt.err (!%p280_p3)
}
  0x24   :  { %s314_s0 = smov 128   ;;  %s315_s10 = smov 8  }
  0x25   :  { %32 = dma.hbm_to_vmem [thread:$0]  %s390_s1, 2048, %s340_s15, [#allocation6], %s314_s0, %s314_s0, %s315_s10  }
  0x26   :  { %306 = dma.done.wait [#allocation3], 32  }
  0x27   :  { %307 = vsyncadd [#allocation3], 4294967264 }
  0x28   :  { %308 = dma.done.wait [#allocation6], 2048  }
  0x29   :  { %309 = vsyncadd [#allocation6], 4294965248  ;;  %v316_v0 = vmov 0.0|0.0   ;;  %vm317_vm0 = vmmov 0   ;;  %v318_v1 = vmov 0.0   ;;  %v42_v2 = vld [vmem:[#allocation5] sm:$0xff] }
  0x2a   :  { %206 = vmatprep.subr.bf16.mxu0 %v316_v0  ;;  %203 = vmatprep.mubr.msk.f32.mxu0 %vm317_vm0, %v318_v1  ;;  %v43_v3 = vld [vmem:[#allocation5 + $0x8] sm:$0xff]  ;;  %v44_v5 = vld [vmem:[#allocation5 + $0x10] sm:$0xff]  ;;  %v45_v6 = vld [vmem:[#allocation5 + $0x18] sm:$0xff]  ;;  %s319_s14 = smov [#allocation7]  }
  0x2b   :  { %v207_v4 = vpack.c.bf16 %v43_v3, %v42_v2  ;;  %v210_v7 = vpack.c.bf16 %v45_v6, %v44_v5  ;;  %v46_v8 = vld [vmem:[#allocation5 + $0x20] sm:$0xff]  ;;  %v47_v9 = vld [vmem:[#allocation5 + $0x28] sm:$0xff]  ;;  %v48_v11 = vld [vmem:[#allocation5 + $0x30] sm:$0xff]  ;;  %s143_s15 = sshll.u32 %s319_s14, 4  ;;  %s144_s15 = int_to_ptr.vmem [resolvable:$true] %s143_s15 }
  0x2c   :  { %v213_v10 = vpack.c.bf16 %v47_v9, %v46_v8  ;;  %v49_v12 = vld [vmem:[#allocation5 + $0x38] sm:$0xff]  ;;  %v50_v14 = vld [vmem:[#allocation5 + $0x40] sm:$0xff]  ;;  %v51_v15 = vld [vmem:[#allocation5 + $0x48] sm:$0xff]  ;;  %s284_s16 = scalar_lea.vmem %s144_s15, 32  ;;  %p289_p5 = scmp.lt.s32.totalorder %s144_s15, %s144_s15 }
  0x2d   :  { %208 = vmatpush3.bf16.xpose.msra.mxu0 %v207_v4  ;;  %v216_v13 = vpack.c.bf16 %v49_v12, %v48_v11  ;;  %v219_v16 = vpack.c.bf16 %v51_v15, %v50_v14  ;;  %v52_v17 = vld [vmem:[#allocation5 + $0x50] sm:$0xff]  ;;  %v53_v18 = vld [vmem:[#allocation5 + $0x58] sm:$0xff]  ;;  %v54_v20 = vld [vmem:[#allocation5 + $0x60] sm:$0xff]  ;;  %p285_p4 = scmp.ne.s32.totalorder %s144_s15, %s284_s16  ;;  %p290_p6 = scmp.lt.s32.totalorder %s284_s16, %s284_s16 }
  0x2e   :  { %209 = vmatprep.subr.bf16.mxu0 %v316_v0  ;;  %v222_v19 = vpack.c.bf16 %v53_v18, %v52_v17  ;;  %v55_v21 = vld [vmem:[#allocation5 + $0x68] sm:$0xff]  ;;  %v56_v23 = vld [vmem:[#allocation5 + $0x70] sm:$0xff]  ;;  %v57_v24 = vld [vmem:[#allocation5 + $0x78] sm:$0xff] }
  0x2f   :  { %v225_v22 = vpack.c.bf16 %v55_v21, %v54_v20  ;;  %v228_v25 = vpack.c.bf16 %v57_v24, %v56_v23  ;;  %v41_v26 = vld [vmem:[#allocation2] sm:$0x3]  ;;  %p291_p7 = por %p290_p6, %p289_p5 }
  0x30   :  { %v153_v27 = vld [vmem:[%s391_s2] ss:$0 sm:$0xff] }
  0x31   :  { %p292_p8 = pnand %p291_p7, %p285_p4 }
  0x35   :  { %211 = vmatpush3.bf16.xpose.msra.mxu0 %v210_v7 }
  0x36   :  { %212 = vmatprep.subr.bf16.mxu0 %v316_v0 }
  0x3d   :  { %214 = vmatpush3.bf16.xpose.msra.mxu0 %v213_v10 }
  0x3e   :  { %215 = vmatprep.subr.bf16.mxu0 %v316_v0 }
  0x45   :  { %217 = vmatpush3.bf16.xpose.msra.mxu0 %v216_v13 }
  0x46   :  { %218 = vmatprep.subr.bf16.mxu0 %v316_v0 }
  0x4d   :  { %220 = vmatpush3.bf16.xpose.msra.mxu0 %v219_v16 }
  0x4e   :  { %221 = vmatprep.subr.bf16.mxu0 %v316_v0 }
  0x55   :  { %223 = vmatpush3.bf16.xpose.msra.mxu0 %v222_v19 }
  0x56   :  { %224 = vmatprep.subr.bf16.mxu0 %v316_v0 }
  0x5d   :  { %226 = vmatpush3.bf16.xpose.msra.mxu0 %v225_v22 }
  0x5e   :  { %227 = vmatprep.subr.bf16.mxu0 %v316_v0 }
  0x65   :  { %229 = vmatpush3.bf16.xpose.msra.mxu0 %v228_v25 }
  0x6c   :  { %204 = vmatmul.mubr.f32.vlgmr.msra.gmra.mrb[0].mxu0 %v41_v26 }
 0x13f   :  { %v131_v28 = vpop.f32.mrb[0].mxu0 }
 0x140   :  { %v132_v29 = vadd.f32 %v153_v27, %v131_v28  ;;  %v205_v30 = vpop.f32.mrb[1].mxu0 }
 0x142   :  { %238 = vtanh.f32 %v132_v29 }
 0x14c   :  { %v239_v31 = vpop.eup %238 }
 0x14d   :  { %136 = vst [vmem:[#allocation7] sm:$0x3] %v239_v31 }
 0x14e   :  { %295 = shalt.err (!%p292_p8)
}
 0x14f   :  { %s296_s2 = scalar_lea.hbm %s392_s3, 32 }
 0x150   :  { %p297_p9 = scmp.ne.s32.totalorder %s392_s3, %s296_s2  ;;  %p300_p10 = scmp.lt.u32.totalorder %s296_s2, %s392_s3 }
 0x152   :  { %p302_p11 = pnand %p300_p10, %p297_p9 }
 0x154   :  { %305 = shalt.err (!%p302_p11)
}
 0x155   :  { %146 = dma.vmem_to_hbm [thread:$0]  %s144_s15, 32, %s392_s3, [#allocation4]  }
 0x156   :  { %310 = dma.done.wait [#allocation4], 32  }
 0x157   :  { %311 = vsyncadd [#allocation4], 4294967264 }
 0x158   :  { %150 = vsyncpa [#allocation3], 1 }
 0x159   :  { %151 = vsyncpa [#allocation6], 1 }
 0x15a   :  { %152 = vsyncpa [#allocation4], 1 }

</bundles_post_ra>
